<compile_context>
chip_gen: v6e
topology: v6e:2x2x1
jax: 0.10.0
libtpu: 0.0.40
codegen_flags: <defaults>
</compile_context>

<pallas_src>
import functools

import jax
import jax.numpy as jnp
from jax import lax
from jax.experimental import pallas as pl
from jax.experimental.pallas import tpu as pltpu


def _lse_rows(rows):
    """logsumexp over a short python list of [1, W] rows (lane-dense over W)."""
    if len(rows) == 2:
        a, b = rows
        m = jnp.maximum(a, b)
        # 2-term identity: one EUP exp + one log1p per element.
        return m + jnp.log1p(jnp.exp(-jnp.abs(a - b)))
    m = rows[0]
    for r in rows[1:]:
        m = jnp.maximum(m, r)
    s = jnp.exp(rows[0] - m)
    for r in rows[1:]:
        s = s + jnp.exp(r - m)
    return m + jnp.log(s)


def gbp_kernel(h_ref,      # SMEM [C, C]        pairwise potential H
               src_ref,    # VMEM [1, E_pad]    int32 edge source node (gather)
               dst_ref,    # VMEM [E_pad, 1]    int32 edge target node (scatter)
               xt_ref,     # VMEM [in_dim, N_pad]  node features, transposed
               wt_ref,     # VMEM [C, in_dim]   fused MLP weight, transposed
               bt_ref,     # VMEM [C, 1]        fused MLP bias
               out_ref,    # VMEM [C, N_pad]    normalized log beliefs (cat-major)
               zlp_ref,    # scratch [C, N_pad] zero_log_ps
               lp_ref,     # scratch [C, N_pad] belief carry
               lm_ref,     # scratch [C, E_pad] message carry
               g_ref,      # scratch [N_pad, E_pad] gather one-hot (built in-kernel)
               s_ref,      # scratch [E_pad, N_pad] scatter one-hot (built in-kernel)
               *, n_cats, bp_iterations):
    n_pad, e_pad = g_ref.shape

    # ---- one-hot gather / scatter matrices, built ONCE in-kernel ------------
    iota_ne = lax.broadcasted_iota(jnp.int32, (n_pad, e_pad), 0)
    g_ref[...] = (iota_ne == src_ref[...]).astype(jnp.float32)      # G[n,e]=src[e]==n
    iota_en = lax.broadcasted_iota(jnp.int32, (e_pad, n_pad), 1)
    s_ref[...] = (iota_en == dst_ref[...]).astype(jnp.float32)      # S[e,n]=dst[e]==n

    # ---- self potentials: ONE fused MXU matmul (MLP collapsed) --------------
    logits = jnp.dot(wt_ref[...], xt_ref[...],
                     preferred_element_type=jnp.float32) + bt_ref[...]  # [C, N_pad]
    logits = jnp.maximum(logits, 0.0)             # ReLU only after out_layer
    lse0 = _lse_rows([logits[i:i + 1, :] for i in range(n_cats)])       # [1, N_pad]
    zlp_ref[...] = logits - lse0                  # log-softmax over categories
    lp_ref[...] = zlp_ref[...]
    lm_ref[...] = jnp.zeros_like(lm_ref)          # reference: 1/c * zeros == zeros

    # Hoist the C*C H-matrix scalars out of the BP loop (SMEM reads done once).
    h_c = [[h_ref[i, j] for j in range(n_cats)] for i in range(n_cats)]

    # --------------------------- belief propagation --------------------------
    def bp_iter(_, carry):
        # Gather source-node beliefs for every edge: [C,N] @ [N,E] -> [C,E].
        lp_src = jnp.dot(lp_ref[...], g_ref[...],
                         preferred_element_type=jnp.float32)
        t = lp_src - lm_ref[...]                                    # [C, E_pad]
        t_rows = [t[j:j + 1, :] for j in range(n_cats)]
        for i in range(n_cats):
            lm_ref[i:i + 1, :] = _lse_rows(
                [h_c[i][j] + t_rows[j] for j in range(n_cats)])
        # Scatter-add messages onto their target node: [C,E] @ [E,N] -> [C,N].
        lp_ref[...] = zlp_ref[...] + jnp.dot(lm_ref[...], s_ref[...],
                                             preferred_element_type=jnp.float32)
        return carry

    lax.fori_loop(0, bp_iterations, bp_iter, 0)

    # ------------- normalize: log_ps - logsumexp(log_ps) per node ------------
    lp = lp_ref[...]                                                # [C, N_pad]
    lse = _lse_rows([lp[i:i + 1, :] for i in range(n_cats)])        # [1, N_pad]
    out_ref[...] = lp - lse                        # lane-dense store over nodes


def _padded_vmem_bytes(shape, itemsize=4):
    """Estimate VMEM footprint of a buffer after (8, 128) tile padding."""
    shape = tuple(shape)
    if len(shape) == 1:
        shape = (1,) + shape
    lead = 1
    for d in shape[:-2]:
        lead *= d
    sub = -(-shape[-2] // 8) * 8
    lane = -(-shape[-1] // 128) * 128
    return lead * sub * lane * itemsize


def graph_bp_forward(params, edges, X, *, n_nodes, n_cats, n_hidden_layers,
                     bp_iterations):
    n_edges = edges.shape[0]
    in_dim = X.shape[1]
    n_pad = max(128, -(-n_nodes // 128) * 128)   # lane-dense node axis
    e_pad = max(128, -(-n_edges // 128) * 128)   # lane-dense edge axis

    dst = edges[:, 0].astype(jnp.int32)   # aggregation target (`e[0] == node`)
    src = edges[:, 1].astype(jnp.int32)   # belief source (other endpoint)
    # Padded edges: src -> 0 (harmless gather), dst -> -1 (one-hot row all-zero).
    src_row = jnp.concatenate(
        [src, jnp.zeros((e_pad - n_edges,), jnp.int32)]).reshape(1, e_pad)
    dst_col = jnp.concatenate(
        [dst, jnp.full((e_pad - n_edges,), -1, jnp.int32)]).reshape(e_pad, 1)

    # Collapse the activation-free Linear stack into a single affine map.
    w = params["w_in"]                    # [in_dim, hid]
    b = params["b_in"]                    # [1, hid]
    for l in range(n_hidden_layers):
        w = w @ params["wh"][l]
        b = b @ params["wh"][l] + params["bh"][l]
    w = w @ params["w_out"]               # W_eff: [in_dim, n_cats]
    b = b @ params["w_out"] + params["b_out"]   # b_eff: [1, n_cats]

    xt = jnp.zeros((in_dim, n_pad), jnp.float32).at[:, :n_nodes].set(X.T)
    wt = w.T.astype(jnp.float32)          # [n_cats, in_dim]
    bt = b.T.astype(jnp.float32)          # [n_cats, 1]

    kernel = functools.partial(gbp_kernel, n_cats=n_cats,
                               bp_iterations=bp_iterations)

    vmem = pl.BlockSpec(memory_space=pltpu.MemorySpace.VMEM)
    smem = pl.BlockSpec(memory_space=pltpu.MemorySpace.SMEM)

    # VMEM budget from the real (tile-padded) buffer set, with 2x headroom.
    buf_bytes = (
        _padded_vmem_bytes((1, e_pad)) + _padded_vmem_bytes((e_pad, 1)) +
        _padded_vmem_bytes((in_dim, n_pad)) + _padded_vmem_bytes((n_cats, in_dim)) +
        _padded_vmem_bytes((n_cats, 1)) + _padded_vmem_bytes((n_cats, n_pad)) +
        2 * _padded_vmem_bytes((n_cats, n_pad)) +
        _padded_vmem_bytes((n_cats, e_pad)) +
        _padded_vmem_bytes((n_pad, e_pad)) + _padded_vmem_bytes((e_pad, n_pad)))
    vmem_limit = min(max(2 * buf_bytes + (1 << 20), 8 << 20), 100 << 20)

    out_cm = pl.pallas_call(
        kernel,
        out_shape=jax.ShapeDtypeStruct((n_cats, n_pad), jnp.float32),
        in_specs=[smem, vmem, vmem, vmem, vmem, vmem],
        out_specs=vmem,
        scratch_shapes=[
            pltpu.VMEM((n_cats, n_pad), jnp.float32),   # zero_log_ps
            pltpu.VMEM((n_cats, n_pad), jnp.float32),   # belief carry
            pltpu.VMEM((n_cats, e_pad), jnp.float32),   # message carry
            pltpu.VMEM((n_pad, e_pad), jnp.float32),    # gather one-hot
            pltpu.VMEM((e_pad, n_pad), jnp.float32),    # scatter one-hot
        ],
        compiler_params=pltpu.CompilerParams(vmem_limit_bytes=int(vmem_limit)),
    )(params["H"], src_row, dst_col, xt, wt, bt)

    return out_cm[:, :n_nodes].T    # [n_nodes, n_cats], matching PyTorch forward


def make_params(key, *, in_dim, hidden_dim, n_hidden_layers, n_cats):
    ks = jax.random.split(key, 8)
    scale = 0.1
    return {
        # Linear weights stored [in, out] (transpose of PyTorch nn.Linear.weight)
        "w_in": scale * jax.random.normal(ks[0], (in_dim, hidden_dim), jnp.float32),
        "b_in": scale * jax.random.normal(ks[1], (1, hidden_dim), jnp.float32),
        "wh": scale * jax.random.normal(ks[2], (n_hidden_layers, hidden_dim, hidden_dim), jnp.float32),
        "bh": scale * jax.random.normal(ks[3], (n_hidden_layers, 1, hidden_dim), jnp.float32),
        "w_out": scale * jax.random.normal(ks[4], (hidden_dim, n_cats), jnp.float32),
        "b_out": scale * jax.random.normal(ks[5], (1, n_cats), jnp.float32),
        # H_matrix is zeros in __init__; use small deterministic values so BP is non-trivial
        "H": scale * jax.random.normal(ks[6], (n_cats, n_cats), jnp.float32),
    }


if __name__ == "__main__":
    n_nodes = 16
    in_dim = 8
    hidden_dim = 32
    n_hidden_layers = 3
    n_cats = 2
    bp_iterations = 3

    key = jax.random.PRNGKey(0)
    pkey, xkey = jax.random.split(key)
    params = make_params(pkey, in_dim=in_dim, hidden_dim=hidden_dim,
                         n_hidden_layers=n_hidden_layers, n_cats=n_cats)

    # node features
    X = jax.random.normal(xkey, (n_nodes, in_dim), jnp.float32)

    # ring graph, both directions: 2 * n_nodes = 32 directed edges
    idx = jnp.arange(n_nodes, dtype=jnp.int32)
    nxt = (idx + 1) % n_nodes
    edges = jnp.concatenate(
        [jnp.stack([idx, nxt], axis=1), jnp.stack([nxt, idx], axis=1)], axis=0)  # [32, 2]

    out = graph_bp_forward(params, edges, X,
                           n_nodes=n_nodes, n_cats=n_cats,
                           n_hidden_layers=n_hidden_layers,
                           bp_iterations=bp_iterations)
    out = jax.block_until_ready(out)
    assert out.shape == (n_nodes, n_cats)
    print("KERNEL_OK")
</pallas_src>

<mosaic_0001>
module attributes {stable_mosaic.version = 11 : i64} {
  func.func @gbp_kernel(%arg0: memref<2x2xf32, #tpu.memory_space<smem>>, %arg1: memref<1x128xi32, #tpu.memory_space<vmem>>, %arg2: memref<128x1xi32, #tpu.memory_space<vmem>>, %arg3: memref<8x128xf32, #tpu.memory_space<vmem>>, %arg4: memref<2x8xf32, #tpu.memory_space<vmem>>, %arg5: memref<2x1xf32, #tpu.memory_space<vmem>>, %arg6: memref<2x128xf32, #tpu.memory_space<vmem>>, %arg7: memref<2x128xf32, #tpu.memory_space<vmem>>, %arg8: memref<2x128xf32, #tpu.memory_space<vmem>>, %arg9: memref<2x128xf32, #tpu.memory_space<vmem>>, %arg10: memref<128x128xf32, #tpu.memory_space<vmem>>, %arg11: memref<128x128xf32, #tpu.memory_space<vmem>>) attributes {dimension_semantics = [], scalar_prefetch = 0 : i64, scratch_operands = 5 : i64, tpu.core_type = #tpu.core_type<tc>} {
    %0 = tpu.iota {dimensions = array<i32: 0>} : vector<128x128xi32>
    %c0 = arith.constant 0 : index
    %c0_0 = arith.constant 0 : index
    %1 = vector.load %arg1[%c0, %c0_0] : memref<1x128xi32, #tpu.memory_space<vmem>>, vector<1x128xi32>
    %2 = vector.broadcast %1 : vector<1x128xi32> to vector<128x128xi32>
    %3 = arith.cmpi eq, %0, %2 : vector<128x128xi32>
    %4 = arith.extui %3 : vector<128x128xi1> to vector<128x128xi32>
    %5 = arith.sitofp %4 : vector<128x128xi32> to vector<128x128xf32>
    %c0_1 = arith.constant 0 : index
    %c0_2 = arith.constant 0 : index
    %6 = vector.load %arg10[%c0_1, %c0_2] : memref<128x128xf32, #tpu.memory_space<vmem>>, vector<128x128xf32>
    tpu.vector_store %arg10[%c0_1, %c0_2], %5 {strides = array<i32>} : memref<128x128xf32, #tpu.memory_space<vmem>>, vector<128x128xf32>,
    %7 = tpu.iota {dimensions = array<i32: 1>} : vector<128x128xi32>
    %c0_3 = arith.constant 0 : index
    %c0_4 = arith.constant 0 : index
    %8 = vector.load %arg2[%c0_3, %c0_4] : memref<128x1xi32, #tpu.memory_space<vmem>>, vector<128x1xi32>
    %9 = vector.broadcast %8 : vector<128x1xi32> to vector<128x128xi32>
    %10 = arith.cmpi eq, %7, %9 : vector<128x128xi32>
    %11 = arith.extui %10 : vector<128x128xi1> to vector<128x128xi32>
    %12 = arith.sitofp %11 : vector<128x128xi32> to vector<128x128xf32>
    %c0_5 = arith.constant 0 : index
    %c0_6 = arith.constant 0 : index
    %13 = vector.load %arg11[%c0_5, %c0_6] : memref<128x128xf32, #tpu.memory_space<vmem>>, vector<128x128xf32>
    tpu.vector_store %arg11[%c0_5, %c0_6], %12 {strides = array<i32>} : memref<128x128xf32, #tpu.memory_space<vmem>>, vector<128x128xf32>,
    %c0_7 = arith.constant 0 : index
    %c0_8 = arith.constant 0 : index
    %14 = vector.load %arg4[%c0_7, %c0_8] : memref<2x8xf32, #tpu.memory_space<vmem>>, vector<2x8xf32>
    %c0_9 = arith.constant 0 : index
    %c0_10 = arith.constant 0 : index
    %15 = vector.load %arg3[%c0_9, %c0_10] : memref<8x128xf32, #tpu.memory_space<vmem>>, vector<8x128xf32>
    %cst = arith.constant dense<0.000000e+00> : vector<2x128xf32>
    %16 = tpu.matmul %14, %15, %cst {dimension_numbers = #tpu.dot_dimension_numbers<[1], [0], [0], [1], [0, 0, 1, 1], [], []>} : vector<2x8xf32>, vector<8x128xf32>, vector<2x128xf32> -> vector<2x128xf32>
    %c0_11 = arith.constant 0 : index
    %c0_12 = arith.constant 0 : index
    %17 = vector.load %arg5[%c0_11, %c0_12] : memref<2x1xf32, #tpu.memory_space<vmem>>, vector<2x1xf32>
    %18 = vector.broadcast %17 : vector<2x1xf32> to vector<2x128xf32>
    %19 = arith.addf %16, %18 : vector<2x128xf32>
    %cst_13 = arith.constant 0.000000e+00 : f32
    %20 = vector.broadcast %cst_13 : f32 to vector<2x128xf32>
    %21 = arith.maximumf %19, %20 : vector<2x128xf32>
    %22 = vector.extract_strided_slice %21 {offsets = [0, 0], sizes = [1, 128], strides = [1, 1]} : vector<2x128xf32> to vector<1x128xf32>
    %23 = vector.extract_strided_slice %21 {offsets = [1, 0], sizes = [1, 128], strides = [1, 1]} : vector<2x128xf32> to vector<1x128xf32>
    %24 = arith.maximumf %22, %23 : vector<1x128xf32>
    %25 = arith.subf %22, %23 : vector<1x128xf32>
    %26 = math.absf %25 : vector<1x128xf32>
    %cst_14 = arith.constant 0.000000e+00 : f32
    %27 = vector.broadcast %cst_14 : f32 to vector<1x128xf32>
    %28 = arith.subf %27, %26 : vector<1x128xf32>
    %29 = math.exp %28 : vector<1x128xf32>
    %30 = math.log1p %29 : vector<1x128xf32>
    %31 = arith.addf %24, %30 : vector<1x128xf32>
    %32 = vector.broadcast %31 : vector<1x128xf32> to vector<2x128xf32>
    %33 = arith.subf %21, %32 : vector<2x128xf32>
    %c0_15 = arith.constant 0 : index
    %c0_16 = arith.constant 0 : index
    %34 = vector.load %arg7[%c0_15, %c0_16] : memref<2x128xf32, #tpu.memory_space<vmem>>, vector<2x128xf32>
    tpu.vector_store %arg7[%c0_15, %c0_16], %33 {strides = array<i32>} : memref<2x128xf32, #tpu.memory_space<vmem>>, vector<2x128xf32>,
    %c0_17 = arith.constant 0 : index
    %c0_18 = arith.constant 0 : index
    %35 = vector.load %arg7[%c0_17, %c0_18] : memref<2x128xf32, #tpu.memory_space<vmem>>, vector<2x128xf32>
    %c0_19 = arith.constant 0 : index
    %c0_20 = arith.constant 0 : index
    %36 = vector.load %arg8[%c0_19, %c0_20] : memref<2x128xf32, #tpu.memory_space<vmem>>, vector<2x128xf32>
    tpu.vector_store %arg8[%c0_19, %c0_20], %35 {strides = array<i32>} : memref<2x128xf32, #tpu.memory_space<vmem>>, vector<2x128xf32>,
    %cst_21 = arith.constant 0.000000e+00 : f32
    %37 = vector.broadcast %cst_21 : f32 to vector<2x128xf32>
    %c0_22 = arith.constant 0 : index
    %c0_23 = arith.constant 0 : index
    %38 = vector.load %arg9[%c0_22, %c0_23] : memref<2x128xf32, #tpu.memory_space<vmem>>, vector<2x128xf32>
    tpu.vector_store %arg9[%c0_22, %c0_23], %37 {strides = array<i32>} : memref<2x128xf32, #tpu.memory_space<vmem>>, vector<2x128xf32>,
    %c0_24 = arith.constant 0 : index
    %c0_25 = arith.constant 0 : index
    %39 = memref.load %arg0[%c0_24, %c0_25] : memref<2x2xf32, #tpu.memory_space<smem>>
    %c0_26 = arith.constant 0 : index
    %c1 = arith.constant 1 : index
    %40 = memref.load %arg0[%c0_26, %c1] : memref<2x2xf32, #tpu.memory_space<smem>>
    %c1_27 = arith.constant 1 : index
    %c0_28 = arith.constant 0 : index
    %41 = memref.load %arg0[%c1_27, %c0_28] : memref<2x2xf32, #tpu.memory_space<smem>>
    %c1_29 = arith.constant 1 : index
    %c1_30 = arith.constant 1 : index
    %42 = memref.load %arg0[%c1_29, %c1_30] : memref<2x2xf32, #tpu.memory_space<smem>>
    %c0_i32 = arith.constant 0 : i32
    %c3_i32 = arith.constant 3 : i32
    %43 = arith.addi %c0_i32, %c3_i32 : i32
    %c1_i32 = arith.constant 1 : i32
    scf.for %arg12 = %c0_i32 to %43 step %c1_i32  : i32 {
      %c0_36 = arith.constant 0 : index
      %c0_37 = arith.constant 0 : index
      %58 = vector.load %arg8[%c0_36, %c0_37] : memref<2x128xf32, #tpu.memory_space<vmem>>, vector<2x128xf32>
      %c0_38 = arith.constant 0 : index
      %c0_39 = arith.constant 0 : index
      %59 = vector.load %arg10[%c0_38, %c0_39] : memref<128x128xf32, #tpu.memory_space<vmem>>, vector<128x128xf32>
      %cst_40 = arith.constant dense<0.000000e+00> : vector<2x128xf32>
      %60 = tpu.matmul %58, %59, %cst_40 {dimension_numbers = #tpu.dot_dimension_numbers<[1], [0], [0], [1], [0, 0, 1, 1], [], []>} : vector<2x128xf32>, vector<128x128xf32>, vector<2x128xf32> -> vector<2x128xf32>
      %c0_41 = arith.constant 0 : index
      %c0_42 = arith.constant 0 : index
      %61 = vector.load %arg9[%c0_41, %c0_42] : memref<2x128xf32, #tpu.memory_space<vmem>>, vector<2x128xf32>
      %62 = arith.subf %60, %61 : vector<2x128xf32>
      %63 = vector.extract_strided_slice %62 {offsets = [0, 0], sizes = [1, 128], strides = [1, 1]} : vector<2x128xf32> to vector<1x128xf32>
      %64 = vector.extract_strided_slice %62 {offsets = [1, 0], sizes = [1, 128], strides = [1, 1]} : vector<2x128xf32> to vector<1x128xf32>
      %65 = vector.broadcast %39 : f32 to vector<1x128xf32>
      %66 = arith.addf %65, %63 : vector<1x128xf32>
      %67 = vector.broadcast %40 : f32 to vector<1x128xf32>
      %68 = arith.addf %67, %64 : vector<1x128xf32>
      %69 = arith.maximumf %66, %68 : vector<1x128xf32>
      %70 = arith.subf %66, %68 : vector<1x128xf32>
      %71 = math.absf %70 : vector<1x128xf32>
      %cst_43 = arith.constant 0.000000e+00 : f32
      %72 = vector.broadcast %cst_43 : f32 to vector<1x128xf32>
      %73 = arith.subf %72, %71 : vector<1x128xf32>
      %74 = math.exp %73 : vector<1x128xf32>
      %75 = math.log1p %74 : vector<1x128xf32>
      %76 = arith.addf %69, %75 : vector<1x128xf32>
      %c0_44 = arith.constant 0 : index
      %c0_45 = arith.constant 0 : index
      %77 = vector.load %arg9[%c0_44, %c0_45] : memref<2x128xf32, #tpu.memory_space<vmem>>, vector<1x128xf32>
      tpu.vector_store %arg9[%c0_44, %c0_45], %76 {strides = array<i32>} : memref<2x128xf32, #tpu.memory_space<vmem>>, vector<1x128xf32>,
      %78 = vector.broadcast %41 : f32 to vector<1x128xf32>
      %79 = arith.addf %78, %63 : vector<1x128xf32>
      %80 = vector.broadcast %42 : f32 to vector<1x128xf32>
      %81 = arith.addf %80, %64 : vector<1x128xf32>
      %82 = arith.maximumf %79, %81 : vector<1x128xf32>
      %83 = arith.subf %79, %81 : vector<1x128xf32>
      %84 = math.absf %83 : vector<1x128xf32>
      %cst_46 = arith.constant 0.000000e+00 : f32
      %85 = vector.broadcast %cst_46 : f32 to vector<1x128xf32>
      %86 = arith.subf %85, %84 : vector<1x128xf32>
      %87 = math.exp %86 : vector<1x128xf32>
      %88 = math.log1p %87 : vector<1x128xf32>
      %89 = arith.addf %82, %88 : vector<1x128xf32>
      %c1_47 = arith.constant 1 : index
      %c0_48 = arith.constant 0 : index
      %90 = vector.load %arg9[%c1_47, %c0_48] : memref<2x128xf32, #tpu.memory_space<vmem>>, vector<1x128xf32>
      tpu.vector_store %arg9[%c1_47, %c0_48], %89 {strides = array<i32>} : memref<2x128xf32, #tpu.memory_space<vmem>>, vector<1x128xf32>,
      %c0_49 = arith.constant 0 : index
      %c0_50 = arith.constant 0 : index
      %91 = vector.load %arg7[%c0_49, %c0_50] : memref<2x128xf32, #tpu.memory_space<vmem>>, vector<2x128xf32>
      %c0_51 = arith.constant 0 : index
      %c0_52 = arith.constant 0 : index
      %92 = vector.load %arg9[%c0_51, %c0_52] : memref<2x128xf32, #tpu.memory_space<vmem>>, vector<2x128xf32>
      %c0_53 = arith.constant 0 : index
      %c0_54 = arith.constant 0 : index
      %93 = vector.load %arg11[%c0_53, %c0_54] : memref<128x128xf32, #tpu.memory_space<vmem>>, vector<128x128xf32>
      %cst_55 = arith.constant dense<0.000000e+00> : vector<2x128xf32>
      %94 = tpu.matmul %92, %93, %cst_55 {dimension_numbers = #tpu.dot_dimension_numbers<[1], [0], [0], [1], [0, 0, 1, 1], [], []>} : vector<2x128xf32>, vector<128x128xf32>, vector<2x128xf32> -> vector<2x128xf32>
      %95 = arith.addf %91, %94 : vector<2x128xf32>
      %c0_56 = arith.constant 0 : index
      %c0_57 = arith.constant 0 : index
      %96 = vector.load %arg8[%c0_56, %c0_57] : memref<2x128xf32, #tpu.memory_space<vmem>>, vector<2x128xf32>
      tpu.vector_store %arg8[%c0_56, %c0_57], %95 {strides = array<i32>} : memref<2x128xf32, #tpu.memory_space<vmem>>, vector<2x128xf32>,
    }
    %c0_31 = arith.constant 0 : index
    %c0_32 = arith.constant 0 : index
    %44 = vector.load %arg8[%c0_31, %c0_32] : memref<2x128xf32, #tpu.memory_space<vmem>>, vector<2x128xf32>
    %45 = vector.extract_strided_slice %44 {offsets = [0, 0], sizes = [1, 128], strides = [1, 1]} : vector<2x128xf32> to vector<1x128xf32>
    %46 = vector.extract_strided_slice %44 {offsets = [1, 0], sizes = [1, 128], strides = [1, 1]} : vector<2x128xf32> to vector<1x128xf32>
    %47 = arith.maximumf %45, %46 : vector<1x128xf32>
    %48 = arith.subf %45, %46 : vector<1x128xf32>
    %49 = math.absf %48 : vector<1x128xf32>
    %cst_33 = arith.constant 0.000000e+00 : f32
    %50 = vector.broadcast %cst_33 : f32 to vector<1x128xf32>
    %51 = arith.subf %50, %49 : vector<1x128xf32>
    %52 = math.exp %51 : vector<1x128xf32>
    %53 = math.log1p %52 : vector<1x128xf32>
    %54 = arith.addf %47, %53 : vector<1x128xf32>
    %55 = vector.broadcast %54 : vector<1x128xf32> to vector<2x128xf32>
    %56 = arith.subf %44, %55 : vector<2x128xf32>
    %c0_34 = arith.constant 0 : index
    %c0_35 = arith.constant 0 : index
    %57 = vector.load %arg6[%c0_34, %c0_35] : memref<2x128xf32, #tpu.memory_space<vmem>>, vector<2x128xf32>
    tpu.vector_store %arg6[%c0_34, %c0_35], %56 {strides = array<i32>} : memref<2x128xf32, #tpu.memory_space<vmem>>, vector<2x128xf32>,
    return
  }
}

</mosaic_0001>

<bundles_post_ra>
// kernel: tpu_custom_call.1
= control target key start
LH: loop header
LB: loop body
LE: loop exit
PB: predicated region body
PF: predicated region fallthrough
CT: control target
= control target key end

     0   :  { %11 = vsyncpa [#allocation9], 0  ;;  %s1132_s0 = inlined_call_operand.vmem [shape: f32[2,2], index: 0, kind: input, shape index: {}]   ;;  %s1133_s1 = inlined_call_operand.vmem [shape: s32[1,128], index: 1, kind: input, shape index: {}]   ;;  %s1134_s2 = inlined_call_operand.vmem [shape: s32[128,1], index: 2, kind: input, shape index: {}]   ;;  %s1135_s3 = inlined_call_operand.vmem [shape: f32[8,128], index: 3, kind: input, shape index: {}]   ;;  %s1136_s4 = inlined_call_operand.vmem [shape: f32[2,8], index: 4, kind: input, shape index: {}]   ;;  %s1137_s5 = inlined_call_operand.vmem [shape: f32[2,1], index: 5, kind: input, shape index: {}]   ;;  %s1138_s6 = inlined_call_operand.hbm [shape: f32[2,128], index: 6, kind: output, shape index: {}]  }
   0x1   :  { %12 = vsyncpa [#allocation8], 0  ;;  %s19_s23 = sshll.u32 %s1132_s0, 4  ;;  %s20_s23 = int_to_ptr.vmem [resolvable:$true] %s19_s23 }
   0x2   :  { %s828_s24 = scalar_lea.vmem %s20_s23, 32  ;;  %p833_p1 = scmp.lt.s32.totalorder %s20_s23, %s20_s23 }
   0x3   :  { %p829_p0 = scmp.ne.s32.totalorder %s20_s23, %s828_s24  ;;  %p834_p2 = scmp.lt.s32.totalorder %s828_s24, %s828_s24 }
   0x5   :  { %p835_p3 = por %p834_p2, %p833_p1 }
   0x7   :  { %p836_p4 = pnand %p835_p3, %p829_p0 }
   0x9   :  { %839 = shalt.err (!%p836_p4)
}
   0xa   :  { %s872_s25 = smov [#allocation7]  }
   0xb   :  { %22 = dma.vmem_to_smem %s20_s23, 32, %s872_s25, [#allocation9]  }
   0xc   :  { %864 = dma.done.wait [#allocation9], 32  }
   0xd   :  { %865 = vsyncadd [#allocation9], 4294967264 }
   0xe   :  { %36 = sfence }
   0xf   :  { %v254_v0 = vld [vmem:[%s1135_s3] sm:$0xff]  ;;  %vm261_vm0 = vcmask 64512   ;;  %v873_v2 = vmov 0.0   ;;  %vm874_vm1 = vmmov 0   ;;  %v875_v4 = vmov 0   ;;  %v126_v7 = vld [vmem:[%s1134_s2 + $0x8] sm:$0xff] }
  0x10   :  { %v253_v1 = vld [vmem:[%s1136_s4] sm:$0x3]  ;;  %720 = vmatprep.subr.mxu0 %v873_v2  ;;  %363 = vst [vmem:[#allocation4] sm:$0x3] %v873_v2  ;;  %722 = vmatprep.mubr.msk.f32.mxu0 %vm874_vm1, %v873_v2  ;;  %v37_v5 = vlaneseq  ;;  %v127_v9 = vld [vmem:[%s1134_s2 + $0x10] sm:$0xff]  ;;  %v128_v19 = vld [vmem:[%s1134_s2 + $0x18] sm:$0xff] }
  0x11   :  { %v255_v3 = vld [vmem:[%s1137_s5] sm:$0x3]  ;;  %721 = vmatpush3.msra.mxu0 %v254_v0  ;;  %810 = vset.pattern.permute.xlu0 %v875_v4  ;;  %v130_v28 = vld [vmem:[%s1134_s2 + $0x28] sm:$0xff]  ;;  %v131_v30 = vld [vmem:[%s1134_s2 + $0x30] sm:$0xff]  ;;  %s1038_s9 = sld [smem:[#allocation7]]  ;;  %s1081_s12 = smov 0  }
  0x12   :  { %723 = vmatmul.mubr.msk.f32.vlgmr.msra.gmra.mxu0 %vm261_vm0, %v253_v1  ;;  %258 = vperm.xlu0 %810, %v255_v3   ;;  %v125_v6 = vld [vmem:[%s1134_s2] sm:$0xff]  ;;  %v936_v8 = vshrl.u32 %v37_v5, 7  ;;  %v132_v39 = vld [vmem:[%s1134_s2 + $0x38] sm:$0xff]  ;;  %v134_v48 = vld [vmem:[%s1134_s2 + $0x48] sm:$0xff]  ;;  %v1035_v56 = vand.u32 127, %v37_v5  ;;  %s1041_s10 = sld [smem:[#allocation7 + $0x1]] }
  0x13   :  { %811 = vset.pattern.permute.xlu1 %v875_v4  ;;  %v647_v18 = vld [vmem:[%s1133_s1] ss:$0 sm:$0xff]  ;;  %v135_v49 = vld [vmem:[%s1134_s2 + $0x50] sm:$0xff]  ;;  %v136_v50 = vld [vmem:[%s1134_s2 + $0x58] sm:$0xff]  ;;  %s1047_s11 = sld [smem:[#allocation7 + $0x81]] }
  0x14   :  { %145 = vperm.xlu1 %811, %v126_v7   ;;  %v39_v10 = vadd.s32 8, %v936_v8  ;;  %v40_v11 = vadd.s32 16, %v936_v8  ;;  %v41_v12 = vadd.s32 24, %v936_v8  ;;  %v42_v13 = vadd.s32 32, %v936_v8  ;;  %v129_v27 = vld [vmem:[%s1134_s2 + $0x20] sm:$0xff]  ;;  %v138_v52 = vld [vmem:[%s1134_s2 + $0x68] sm:$0xff] }
  0x15   :  { %v43_v14 = vadd.s32 40, %v936_v8  ;;  %v44_v15 = vadd.s32 48, %v936_v8  ;;  %v45_v16 = vadd.s32 56, %v936_v8  ;;  %v46_v17 = vadd.s32 64, %v936_v8  ;;  %v133_v47 = vld [vmem:[%s1134_s2 + $0x40] sm:$0xff]  ;;  %v139_v53 = vld [vmem:[%s1134_s2 + $0x70] sm:$0xff] }
  0x16   :  { %142 = vperm.xlu0 %810, %v125_v6   ;;  %v47_v20 = vadd.s32 72, %v936_v8  ;;  %v48_v21 = vadd.s32 80, %v936_v8  ;;  %v49_v22 = vadd.s32 88, %v936_v8  ;;  %v50_v23 = vadd.s32 96, %v936_v8  ;;  %v137_v51 = vld [vmem:[%s1134_s2 + $0x60] sm:$0xff]  ;;  %v140_v54 = vld [vmem:[%s1134_s2 + $0x78] sm:$0xff] }
  0x17   :  { %v51_v24 = vadd.s32 104, %v936_v8  ;;  %v52_v25 = vadd.s32 112, %v936_v8  ;;  %v53_v26 = vadd.s32 120, %v936_v8  ;;  %vm59_vm2 = vcmp.eq.s32.totalorder %v936_v8, %v647_v18  ;;  %s1044_s2 = sld [smem:[#allocation7 + $0x80]] }
  0x18   :  { %148 = vperm.xlu1 %811, %v127_v9   ;;  %vm60_vm3 = vcmp.eq.s32.totalorder %v39_v10, %v647_v18  ;;  %vm61_vm4 = vcmp.eq.s32.totalorder %v40_v11, %v647_v18  ;;  %vm62_vm5 = vcmp.eq.s32.totalorder %v41_v12, %v647_v18  ;;  %vm63_vm6 = vcmp.eq.s32.totalorder %v42_v13, %v647_v18 }
  0x19   :  { %vm64_vm7 = vcmp.eq.s32.totalorder %v43_v14, %v647_v18  ;;  %vm65_vm8 = vcmp.eq.s32.totalorder %v44_v15, %v647_v18  ;;  %vm66_vm9 = vcmp.eq.s32.totalorder %v45_v16, %v647_v18  ;;  %vm67_vm10 = vcmp.eq.s32.totalorder %v46_v17, %v647_v18 }
  0x1a   :  { %151 = vperm.xlu0 %810, %v128_v19   ;;  %vm68_vm11 = vcmp.eq.s32.totalorder %v47_v20, %v647_v18  ;;  %vm69_vm12 = vcmp.eq.s32.totalorder %v48_v21, %v647_v18  ;;  %vm70_vm13 = vcmp.eq.s32.totalorder %v49_v22, %v647_v18  ;;  %vm71_vm14 = vcmp.eq.s32.totalorder %v50_v23, %v647_v18 }
  0x1b   :  { %vm72_vm15 = vcmp.eq.s32.totalorder %v51_v24, %v647_v18  ;;  %vm73_vm0 = vcmp.eq.s32.totalorder %v52_v25, %v647_v18  ;;  %vm74_vm1 = vcmp.eq.s32.totalorder %v53_v26, %v647_v18  ;;  %v648_v29 = vsel %vm59_vm2, 1.0, %v873_v2 }
  0x1c   :  { %154 = vperm.xlu1 %811, %v129_v27   ;;  %v649_v31 = vsel %vm60_vm3, 1.0, %v873_v2  ;;  %v650_v32 = vsel %vm61_vm4, 1.0, %v873_v2  ;;  %v651_v33 = vsel %vm62_vm5, 1.0, %v873_v2  ;;  %v652_v34 = vsel %vm63_vm6, 1.0, %v873_v2  ;;  %107 = vst [vmem:[#allocation5 + $0x30] sm:$0xff] %v648_v29 }
  0x1d   :  { %v653_v35 = vsel %vm64_vm7, 1.0, %v873_v2  ;;  %v654_v36 = vsel %vm65_vm8, 1.0, %v873_v2  ;;  %v655_v37 = vsel %vm66_vm9, 1.0, %v873_v2  ;;  %v656_v38 = vsel %vm67_vm10, 1.0, %v873_v2  ;;  %108 = vst [vmem:[#allocation5] sm:$0xff] %v649_v31  ;;  %109 = vst [vmem:[#allocation5 + $0x58] sm:$0xff] %v650_v32 }
  0x1e   :  { %157 = vperm.xlu0 %810, %v130_v28   ;;  %110 = vst [vmem:[#allocation5 + $0x18] sm:$0xff] %v651_v33  ;;  %111 = vst [vmem:[#allocation5 + $0x50] sm:$0xff] %v652_v34  ;;  %v657_v40 = vsel %vm68_vm11, 1.0, %v873_v2  ;;  %v658_v41 = vsel %vm69_vm12, 1.0, %v873_v2  ;;  %v659_v42 = vsel %vm70_vm13, 1.0, %v873_v2  ;;  %v660_v43 = vsel %vm71_vm14, 1.0, %v873_v2 }
  0x1f   :  { %112 = vst [vmem:[#allocation5 + $0x68] sm:$0xff] %v653_v35  ;;  %113 = vst [vmem:[#allocation5 + $0x8] sm:$0xff] %v654_v36  ;;  %v661_v44 = vsel %vm72_vm15, 1.0, %v873_v2  ;;  %v662_v45 = vsel %vm73_vm0, 1.0, %v873_v2  ;;  %v663_v46 = vsel %vm74_vm1, 1.0, %v873_v2 }
  0x20   :  { %114 = vst [vmem:[#allocation5 + $0x48] sm:$0xff] %v655_v37  ;;  %115 = vst [vmem:[#allocation5 + $0x40] sm:$0xff] %v656_v38  ;;  %160 = vperm.xlu1 %811, %v131_v30  }
  0x21   :  { %116 = vst [vmem:[#allocation5 + $0x20] sm:$0xff] %v657_v40  ;;  %117 = vst [vmem:[#allocation5 + $0x10] sm:$0xff] %v658_v41 }
  0x22   :  { %118 = vst [vmem:[#allocation5 + $0x38] sm:$0xff] %v659_v42  ;;  %119 = vst [vmem:[#allocation5 + $0x60] sm:$0xff] %v660_v43  ;;  %163 = vperm.xlu0 %810, %v132_v39  }
  0x23   :  { %120 = vst [vmem:[#allocation5 + $0x70] sm:$0xff] %v661_v44  ;;  %121 = vst [vmem:[#allocation5 + $0x78] sm:$0xff] %v662_v45  ;;  %v357_v44 = vsub.s32 0, %v936_v8 }
  0x24   :  { %122 = vst [vmem:[#allocation5 + $0x28] sm:$0xff] %v663_v46  ;;  %166 = vperm.xlu1 %811, %v133_v47  }
  0x26   :  { %169 = vperm.xlu0 %810, %v134_v48  }
  0x28   :  { %172 = vperm.xlu1 %811, %v135_v49  }
  0x2a   :  { %175 = vperm.xlu0 %810, %v136_v50  }
  0x2c   :  { %178 = vperm.xlu1 %811, %v137_v51  }
  0x2e   :  { %181 = vperm.xlu0 %810, %v138_v52  }
  0x30   :  { %184 = vperm.xlu1 %811, %v139_v53  }
  0x32   :  { %187 = vperm.xlu0 %810, %v140_v54  }
  0x8d   :  { %v1032_v55 = vpop.permute.xlu0 %258 }
  0x8f   :  { %v146_v57 = vpop.permute.xlu1 %145 }
  0x90   :  { %vm190_vm2 = vcmp.eq.s32.totalorder %v1035_v56, %v146_v57 }
  0x91   :  { %v143_v58 = vpop.permute.xlu0 %142  ;;  %v665_v59 = vsel %vm190_vm2, 1.0, %v873_v2 }
  0x92   :  { %vm189_vm3 = vcmp.eq.s32.totalorder %v1035_v56, %v143_v58  ;;  %238 = vst [vmem:[#allocation6 + $0x68] sm:$0xff] %v665_v59 }
  0x93   :  { %v664_v60 = vsel %vm189_vm3, 1.0, %v873_v2  ;;  %v149_v61 = vpop.permute.xlu1 %148 }
  0x94   :  { %237 = vst [vmem:[#allocation6 + $0x28] sm:$0xff] %v664_v60  ;;  %vm191_vm4 = vcmp.eq.s32.totalorder %v1035_v56, %v149_v61 }
  0x95   :  { %v152_v62 = vpop.permute.xlu0 %151  ;;  %v666_v63 = vsel %vm191_vm4, 1.0, %v873_v2 }
  0x96   :  { %vm192_vm5 = vcmp.eq.s32.totalorder %v1035_v56, %v152_v62  ;;  %239 = vst [vmem:[#allocation6 + $0x10] sm:$0xff] %v666_v63 }
  0x97   :  { %v667_v0 = vsel %vm192_vm5, 1.0, %v873_v2  ;;  %v155_v1 = vpop.permute.xlu1 %154 }
  0x98   :  { %240 = vst [vmem:[#allocation6 + $0x40] sm:$0xff] %v667_v0  ;;  %vm193_vm6 = vcmp.eq.s32.totalorder %v1035_v56, %v155_v1 }
  0x99   :  { %v158_v3 = vpop.permute.xlu0 %157  ;;  %v668_v4 = vsel %vm193_vm6, 1.0, %v873_v2 }
  0x9a   :  { %vm194_vm7 = vcmp.eq.s32.totalorder %v1035_v56, %v158_v3  ;;  %241 = vst [vmem:[#allocation6 + $0x48] sm:$0xff] %v668_v4 }
  0x9b   :  { %v669_v5 = vsel %vm194_vm7, 1.0, %v873_v2  ;;  %v161_v6 = vpop.permute.xlu1 %160 }
  0x9c   :  { %242 = vst [vmem:[#allocation6 + $0x30] sm:$0xff] %v669_v5  ;;  %vm195_vm8 = vcmp.eq.s32.totalorder %v1035_v56, %v161_v6 }
  0x9d   :  { %v164_v7 = vpop.permute.xlu0 %163  ;;  %v670_v9 = vsel %vm195_vm8, 1.0, %v873_v2 }
  0x9e   :  { %vm196_vm9 = vcmp.eq.s32.totalorder %v1035_v56, %v164_v7  ;;  %243 = vst [vmem:[#allocation6 + $0x70] sm:$0xff] %v670_v9 }
  0x9f   :  { %v671_v10 = vsel %vm196_vm9, 1.0, %v873_v2  ;;  %v167_v11 = vpop.permute.xlu1 %166 }
  0xa0   :  { %244 = vst [vmem:[#allocation6 + $0x38] sm:$0xff] %v671_v10  ;;  %vm197_vm10 = vcmp.eq.s32.totalorder %v1035_v56, %v167_v11 }
  0xa1   :  { %v170_v12 = vpop.permute.xlu0 %169  ;;  %v672_v13 = vsel %vm197_vm10, 1.0, %v873_v2 }
  0xa2   :  { %vm198_vm11 = vcmp.eq.s32.totalorder %v1035_v56, %v170_v12  ;;  %245 = vst [vmem:[#allocation6 + $0x20] sm:$0xff] %v672_v13 }
  0xa3   :  { %v673_v14 = vsel %vm198_vm11, 1.0, %v873_v2  ;;  %v173_v15 = vpop.permute.xlu1 %172 }
  0xa4   :  { %246 = vst [vmem:[#allocation6 + $0x78] sm:$0xff] %v673_v14  ;;  %vm199_vm12 = vcmp.eq.s32.totalorder %v1035_v56, %v173_v15 }
  0xa5   :  { %v176_v16 = vpop.permute.xlu0 %175  ;;  %v674_v17 = vsel %vm199_vm12, 1.0, %v873_v2 }
  0xa6   :  { %vm200_vm13 = vcmp.eq.s32.totalorder %v1035_v56, %v176_v16  ;;  %247 = vst [vmem:[#allocation6 + $0x18] sm:$0xff] %v674_v17 }
  0xa7   :  { %v675_v18 = vsel %vm200_vm13, 1.0, %v873_v2  ;;  %v179_v19 = vpop.permute.xlu1 %178 }
  0xa8   :  { %248 = vst [vmem:[#allocation6 + $0x58] sm:$0xff] %v675_v18  ;;  %vm201_vm14 = vcmp.eq.s32.totalorder %v1035_v56, %v179_v19 }
  0xa9   :  { %v182_v20 = vpop.permute.xlu0 %181  ;;  %v676_v21 = vsel %vm201_vm14, 1.0, %v873_v2 }
  0xaa   :  { %vm202_vm15 = vcmp.eq.s32.totalorder %v1035_v56, %v182_v20  ;;  %249 = vst [vmem:[#allocation6] sm:$0xff] %v676_v21 }
  0xab   :  { %v677_v22 = vsel %vm202_vm15, 1.0, %v873_v2  ;;  %v185_v23 = vpop.permute.xlu1 %184 }
  0xac   :  { %250 = vst [vmem:[#allocation6 + $0x8] sm:$0xff] %v677_v22  ;;  %vm203_vm0 = vcmp.eq.s32.totalorder %v1035_v56, %v185_v23 }
  0xad   :  { %v188_v24 = vpop.permute.xlu0 %187  ;;  %v678_v25 = vsel %vm203_vm0, 1.0, %v873_v2 }
  0xae   :  { %vm204_vm1 = vcmp.eq.s32.totalorder %v1035_v56, %v188_v24  ;;  %251 = vst [vmem:[#allocation6 + $0x60] sm:$0xff] %v678_v25 }
  0xaf   :  { %v679_v26 = vsel %vm204_vm1, 1.0, %v873_v2 }
  0xb0   :  { %252 = vst [vmem:[#allocation6 + $0x50] sm:$0xff] %v679_v26 }
  0xd2   :  { %v331_v27 = vpop.f32.mrf.mxu0 }
  0xd3   :  { %v332_v28 = vadd.f32 %v331_v27, %v1032_v55 }
  0xd4   :  { %v724_v29 = vpop.f32.mrf.mxu0 }
  0xd5   :  { %v335_v30 = vmax.f32 %v332_v28, 0.0 }
  0xd7   :  { %v337_v31 = vrot.slane %v335_v30, 1 }
  0xd9   :  { %v340_v32 = vsub.f32 %v335_v30, %v337_v31  ;;  %v339_v43 = vmax.f32 %v335_v30, %v337_v31 }
  0xdb   :  { %v341_v33 = vand.u32 2147483647, %v340_v32 }
  0xdd   :  { %v342_v34 = vsub.f32 0.0, %v341_v33 }
  0xdf   :  { %v343_v35 = vmul.f32 1.442695, %v342_v34 }
  0xe1   :  { %812 = vpow2.f32 %v343_v35 }
  0xee   :  { %v813_v36 = vpop.eup %812 }
  0xef   :  { %v345_v37 = vadd.f32 1.0, %v813_v36  ;;  %v348_v38 = vmul.f32 -0.5, %v813_v36  ;;  %v351_v40 = vand.u32 2147483647, %v813_v36 }
  0xf1   :  { %814 = vlog2.f32 %v345_v37  ;;  %v349_v39 = vadd.f32 1.0, %v348_v38  ;;  %vm352_vm2 = vcmp.lt.f32.partialorder %v351_v40, 0.0004427343 }
  0xf3   :  { %v350_v42 = vmul.f32 %v813_v36, %v349_v39 }
  0xfe   :  { %v815_v41 = vpop.eup %814 }
  0xff   :  { %v347_v2 = vmul.f32 0.6931472, %v815_v41 }
 0x101   :  { %v353_v45 = vsel %vm352_vm2, %v350_v42, %v347_v2 }
 0x102   :  { %v354_v46 = vadd.f32 %v353_v45, %v339_v43 }
 0x104   :  { %v358_v47 = vrot.slane %v354_v46, %v357_v44 }
 0x106   :  { %v359_v48 = vsub.f32 %v335_v30, %v358_v47 }
 0x108   :  { %360 = vst [vmem:[#allocation2] sm:$0x3] %v359_v48 }
 0x10f   :  { %v361_v49 = vld [vmem:[#allocation2] sm:$0x3] }
 0x110   :  { %362 = vst [vmem:[#allocation3] sm:$0x3] %v361_v49 }
 0x111 LB: > { %v390_v50 = vld [vmem:[#allocation5 + $0x28] sm:$0xff]  ;;  %v876_v51 = vmov 0.0   ;;  %v389_v52 = vld [vmem:[#allocation5 + $0x78] sm:$0xff]  ;;  %vm877_vm3 = vmmov 0   ;;  %v388_v53 = vld [vmem:[#allocation5 + $0x70] sm:$0xff]  ;;  %v465_v24 = vstv %s1041_s10  ;;  %v489_v25 = vstv %s1047_s11  ;;  %s373_s12 = sadd.s32 1, %s870_s12   ;;  %s870_s12 = sphi %s1081_s12, %s373_s12  }
 0x112   : > { %725 = vmatprep.subr.mxu0 %v876_v51  ;;  %757 = vmatprep.mubr.msk.f32.mxu0 %vm877_vm3, %v876_v51  ;;  %v387_v54 = vld [vmem:[#allocation5 + $0x60] sm:$0xff]  ;;  %v386_v55 = vld [vmem:[#allocation5 + $0x38] sm:$0xff]  ;;  %v385_v56 = vld [vmem:[#allocation5 + $0x10] sm:$0xff]  ;;  %v463_v27 = vstv %s1038_s9  ;;  %v487_v28 = vstv %s1044_s2  ;;  %p370_p5 = scmp.ge.s32.totalorder %s373_s12, 3  }
 0x113   : > { %726 = vmatpush3.msra.mxu0 %v390_v50  ;;  %760 = vmatprep.subr.mxu1 %v876_v51  ;;  %v384_v57 = vld [vmem:[#allocation5 + $0x20] sm:$0xff]  ;;  %v382_v59 = vld [vmem:[#allocation5 + $0x48] sm:$0xff]  ;;  %v379_v62 = vld [vmem:[#allocation5 + $0x50] sm:$0xff]  ;;  %s878_s13 = smov (%p370_p5), [#allocation10]  }
 0x114   : > { %727 = vmatprep.subr.mxu0 %v876_v51  ;;  %792 = vmatprep.mubr.msk.f32.mxu1 %vm877_vm3, %v876_v51  ;;  %v383_v58 = vld [vmem:[#allocation5 + $0x40] sm:$0xff]  ;;  %v381_v60 = vld [vmem:[#allocation5 + $0x8] sm:$0xff]  ;;  %v378_v63 = vld [vmem:[#allocation5 + $0x18] sm:$0xff]  ;;  %s633_s1 = sshll.u32 (%p370_p5), %s878_s13, 4  ;;  %s634_s1 = int_to_ptr.vmem [resolvable:$true] %s633_s1 }
 0x115   : > { %728 = vmatpush3.msra.mxu0 %v389_v52  ;;  %v380_v61 = vld [vmem:[#allocation5 + $0x68] sm:$0xff]  ;;  %v377_v0 = vld [vmem:[#allocation5 + $0x58] sm:$0xff]  ;;  %v376_v1 = vld [vmem:[#allocation5] sm:$0xff]  ;;  %s840_s14 = scalar_lea.vmem (%p370_p5), %s634_s1, 32  ;;  %p845_p7 = scmp.lt.s32.totalorder (%p370_p5), %s634_s1, %s634_s1 }
 0x116   : > { %729 = vmatprep.subr.mxu0 %v876_v51  ;;  %v375_v3 = vld [vmem:[#allocation5 + $0x30] sm:$0xff]  ;;  %v527_v6 = vld [vmem:[#allocation6 + $0x60] sm:$0xff]  ;;  %v526_v7 = vld [vmem:[#allocation6 + $0x8] sm:$0xff]  ;;  %p841_p6 = scmp.ne.s32.totalorder (%p370_p5), %s634_s1, %s840_s14  ;;  %p846_p8 = scmp.lt.s32.totalorder (%p370_p5), %s840_s14, %s840_s14 }
 0x117   : > { %730 = vmatpush3.msra.mxu0 %v388_v53  ;;  %v374_v4 = vld [vmem:[#allocation3] sm:$0x3]  ;;  %v528_v5 = vld [vmem:[#allocation6 + $0x50] sm:$0xff]  ;;  %v525_v9 = vld [vmem:[#allocation6] sm:$0xff] }
 0x118   : > { %731 = vmatprep.subr.mxu0 %v876_v51  ;;  %761 = vmatpush3.msra.mxu1 %v528_v5  ;;  %v524_v10 = vld [vmem:[#allocation6 + $0x58] sm:$0xff]  ;;  %v521_v13 = vld [vmem:[#allocation6 + $0x20] sm:$0xff]  ;;  %v519_v15 = vld [vmem:[#allocation6 + $0x70] sm:$0xff]  ;;  %p847_p9 = por (%p370_p5), %p846_p8, %p845_p7 }
 0x119   : > { %732 = vmatpush3.msra.mxu0 %v387_v54  ;;  %762 = vmatprep.subr.mxu1 %v876_v51  ;;  %v523_v11 = vld [vmem:[#allocation6 + $0x18] sm:$0xff]  ;;  %v518_v16 = vld [vmem:[#allocation6 + $0x30] sm:$0xff]  ;;  %v517_v17 = vld [vmem:[#allocation6 + $0x48] sm:$0xff] }
 0x11a   : > { %733 = vmatprep.subr.mxu0 %v876_v51  ;;  %763 = vmatpush3.msra.mxu1 %v527_v6  ;;  %v522_v12 = vld [vmem:[#allocation6 + $0x78] sm:$0xff]  ;;  %v516_v18 = vld [vmem:[#allocation6 + $0x40] sm:$0xff]  ;;  %v515_v19 = vld [vmem:[#allocation6 + $0x10] sm:$0xff]  ;;  %p848_p10 = pnand (%p370_p5), %p847_p9, %p841_p6 }
 0x11b   : > { %734 = vmatpush3.msra.mxu0 %v386_v55  ;;  %764 = vmatprep.subr.mxu1 %v876_v51  ;;  %v520_v14 = vld [vmem:[#allocation6 + $0x38] sm:$0xff]  ;;  %v514_v20 = vld [vmem:[#allocation6 + $0x68] sm:$0xff] }
 0x11c   : > { %735 = vmatprep.subr.mxu0 %v876_v51  ;;  %765 = vmatpush3.msra.mxu1 %v526_v7  ;;  %v513_v21 = vld [vmem:[#allocation6 + $0x28] sm:$0xff]  ;;  %v461_v22 = vld [vmem:[#allocation4] sm:$0x3] }
 0x11d   : > { %736 = vmatpush3.msra.mxu0 %v385_v56  ;;  %766 = vmatprep.subr.mxu1 %v876_v51 }
 0x11e   : > { %737 = vmatprep.subr.mxu0 %v876_v51  ;;  %767 = vmatpush3.msra.mxu1 %v525_v9 }
 0x11f   : > { %738 = vmatpush3.msra.mxu0 %v384_v57  ;;  %768 = vmatprep.subr.mxu1 %v876_v51 }
 0x120   : > { %739 = vmatprep.subr.mxu0 %v876_v51  ;;  %769 = vmatpush3.msra.mxu1 %v524_v10 }
 0x121   : > { %740 = vmatpush3.msra.mxu0 %v383_v58  ;;  %770 = vmatprep.subr.mxu1 %v876_v51 }
 0x122   : > { %741 = vmatprep.subr.mxu0 %v876_v51  ;;  %771 = vmatpush3.msra.mxu1 %v523_v11 }
 0x123   : > { %742 = vmatpush3.msra.mxu0 %v382_v59  ;;  %772 = vmatprep.subr.mxu1 %v876_v51 }
 0x124   : > { %743 = vmatprep.subr.mxu0 %v876_v51  ;;  %773 = vmatpush3.msra.mxu1 %v522_v12 }
 0x125   : > { %744 = vmatpush3.msra.mxu0 %v381_v60  ;;  %774 = vmatprep.subr.mxu1 %v876_v51 }
 0x126   : > { %745 = vmatprep.subr.mxu0 %v876_v51  ;;  %775 = vmatpush3.msra.mxu1 %v521_v13 }
 0x127   : > { %746 = vmatpush3.msra.mxu0 %v380_v61  ;;  %776 = vmatprep.subr.mxu1 %v876_v51 }
 0x128   : > { %747 = vmatprep.subr.mxu0 %v876_v51  ;;  %777 = vmatpush3.msra.mxu1 %v520_v14 }
 0x129   : > { %748 = vmatpush3.msra.mxu0 %v379_v62  ;;  %778 = vmatprep.subr.mxu1 %v876_v51 }
 0x12a   : > { %749 = vmatprep.subr.mxu0 %v876_v51  ;;  %779 = vmatpush3.msra.mxu1 %v519_v15 }
 0x12b   : > { %750 = vmatpush3.msra.mxu0 %v378_v63  ;;  %780 = vmatprep.subr.mxu1 %v876_v51 }
 0x12c   : > { %751 = vmatprep.subr.mxu0 %v876_v51  ;;  %781 = vmatpush3.msra.mxu1 %v518_v16 }
 0x12d   : > { %752 = vmatpush3.msra.mxu0 %v377_v0  ;;  %782 = vmatprep.subr.mxu1 %v876_v51 }
 0x12e   : > { %753 = vmatprep.subr.mxu0 %v876_v51  ;;  %783 = vmatpush3.msra.mxu1 %v517_v17 }
 0x12f   : > { %754 = vmatpush3.msra.mxu0 %v376_v1  ;;  %784 = vmatprep.subr.mxu1 %v876_v51 }
 0x130   : > { %755 = vmatprep.subr.mxu0 %v876_v51  ;;  %785 = vmatpush3.msra.mxu1 %v516_v18 }
 0x131   : > { %756 = vmatpush3.msra.mxu0 %v375_v3  ;;  %786 = vmatprep.subr.mxu1 %v876_v51 }
 0x132   : > { %758 = vmatmul.mubr.f32.vlgmr.msra.gmra.mxu0 %v374_v4  ;;  %787 = vmatpush3.msra.mxu1 %v515_v19  ;;  %v511_v4 = vld [vmem:[#allocation2] sm:$0x3] }
 0x133   : > { %788 = vmatprep.subr.mxu1 %v876_v51 }
 0x134   : > { %789 = vmatpush3.msra.mxu1 %v514_v20 }
 0x135   : > { %790 = vmatprep.subr.mxu1 %v876_v51 }
 0x136   : > { %791 = vmatpush3.msra.mxu1 %v513_v21 }
 0x1f2   : > { %v457_v23 = vpop.f32.mrf.mxu0 }
 0x1f3   : > { %v462_v26 = vsub.f32 %v457_v23, %v461_v22 }
 0x1f4   : > { %v759_v29 = vpop.f32.mrf.mxu0 }
 0x1f5   : > { %v466_v30 = vadd.f32 %v465_v24, %v462_v26  ;;  %v490_v31 = vadd.f32 %v489_v25, %v462_v26  ;;  %v464_v32 = vadd.f32 %v463_v27, %v462_v26  ;;  %v488_v34 = vadd.f32 %v487_v28, %v462_v26 }
 0x1f7   : > { %v468_v33 = vrot.slane %v466_v30, 1  ;;  %v492_v35 = vrot.slane %v490_v31, 1 }
 0x1f9   : > { %v471_v36 = vsub.f32 %v464_v32, %v468_v33  ;;  %v495_v37 = vsub.f32 %v488_v34, %v492_v35  ;;  %v470_v58 = vmax.f32 %v464_v32, %v468_v33  ;;  %v494_v62 = vmax.f32 %v488_v34, %v492_v35 }
 0x1fb   : > { %v472_v38 = vand.u32 2147483647, %v471_v36  ;;  %v496_v39 = vand.u32 2147483647, %v495_v37 }
 0x1fd   : > { %v473_v40 = vsub.f32 0.0, %v472_v38  ;;  %v497_v41 = vsub.f32 0.0, %v496_v39 }
 0x1ff   : > { %v474_v2 = vmul.f32 1.442695, %v473_v40  ;;  %v498_v42 = vmul.f32 1.442695, %v497_v41 }
 0x201   : > { %816 = vpow2.f32 %v474_v2 }
 0x202   : > { %818 = vpow2.f32 %v498_v42 }
 0x20e   : > { %v817_v43 = vpop.eup %816 }
 0x20f   : > { %v819_v45 = vpop.eup %818  ;;  %v476_v46 = vadd.f32 1.0, %v817_v43  ;;  %v479_v48 = vmul.f32 -0.5, %v817_v43  ;;  %v482_v51 = vand.u32 2147483647, %v817_v43 }
 0x210   : > { %v500_v47 = vadd.f32 1.0, %v819_v45  ;;  %v503_v49 = vmul.f32 -0.5, %v819_v45  ;;  %v506_v53 = vand.u32 2147483647, %v819_v45 }
 0x211   : > { %820 = vlog2.f32 %v476_v46  ;;  %v480_v50 = vadd.f32 1.0, %v479_v48  ;;  %vm483_vm4 = vcmp.lt.f32.partialorder %v482_v51, 0.0004427343 }
 0x212   : > { %822 = vlog2.f32 %v500_v47  ;;  %v504_v52 = vadd.f32 1.0, %v503_v49  ;;  %vm507_vm5 = vcmp.lt.f32.partialorder %v506_v53, 0.0004427343 }
 0x213   : > { %v481_v57 = vmul.f32 %v817_v43, %v480_v50 }
 0x214   : > { %v505_v60 = vmul.f32 %v819_v45, %v504_v52 }
 0x21e   : > { %v821_v54 = vpop.eup %820 }
 0x21f   : > { %v823_v55 = vpop.eup %822  ;;  %v478_v56 = vmul.f32 0.6931472, %v821_v54 }
 0x220   : > { %v502_v59 = vmul.f32 0.6931472, %v823_v55 }
 0x221   : > { %v484_v61 = vsel %vm483_vm4, %v481_v57, %v478_v56 }
 0x222   : > { %v485_v63 = vadd.f32 %v484_v61, %v470_v58  ;;  %v508_v0 = vsel %vm507_vm5, %v505_v60, %v502_v59 }
 0x223   : > { %v509_v1 = vadd.f32 %v508_v0, %v494_v62 }
 0x224   : > { %486 = vst [vmem:[#allocation4] sm:$0x1] %v485_v63 }
 0x225   : > { %510 = vst [vmem:[#allocation4 + $0x1] sm:$0x1] %v509_v1 }
 0x22c   : > { %v512_v3 = vld [vmem:[#allocation4] sm:$0x3] }
 0x22d   : > { %793 = vmatmul.mubr.f32.vlgmr.msra.gmra.mxu1 %v512_v3 }
 0x2ec   :  { %372 = sbr.rel (!%p370_p5) target bundleno = 273 (0x111), region = 55 }
 0x2ed   : > { %v595_v5 = vpop.f32.mrf.mxu1 }
 0x2ee   : > { %v599_v6 = vadd.f32 %v595_v5, %v511_v4 }
 0x2ef   : > { %v794_v7 = vpop.f32.mrf.mxu1 }
 0x2f0   : > { %600 = vst [vmem:[#allocation3] sm:$0x3] %v599_v6 }
 0x2f7   :  { %v601_v9 = vld [vmem:[#allocation3] sm:$0x3] }
 0x2f8   :  { %v603_v10 = vrot.slane %v601_v9, 1 }
 0x2fa   :  { %v606_v11 = vsub.f32 %v601_v9, %v603_v10  ;;  %v605_v22 = vmax.f32 %v601_v9, %v603_v10 }
 0x2fc   :  { %v607_v12 = vand.u32 2147483647, %v606_v11 }
 0x2fe   :  { %v608_v13 = vsub.f32 0.0, %v607_v12 }
 0x300   :  { %v609_v14 = vmul.f32 1.442695, %v608_v13 }
 0x302   :  { %824 = vpow2.f32 %v609_v14 }
 0x30f   :  { %v825_v15 = vpop.eup %824 }
 0x310   :  { %v611_v16 = vadd.f32 1.0, %v825_v15  ;;  %v614_v17 = vmul.f32 -0.5, %v825_v15  ;;  %v617_v19 = vand.u32 2147483647, %v825_v15 }
 0x312   :  { %826 = vlog2.f32 %v611_v16  ;;  %v615_v18 = vadd.f32 1.0, %v614_v17  ;;  %vm618_vm6 = vcmp.lt.f32.partialorder %v617_v19, 0.0004427343 }
 0x314   :  { %v616_v20 = vmul.f32 %v825_v15, %v615_v18 }
 0x31f   :  { %v827_v21 = vpop.eup %826 }
 0x320   :  { %v613_v23 = vmul.f32 0.6931472, %v827_v21 }
 0x322   :  { %v619_v24 = vsel %vm618_vm6, %v616_v20, %v613_v23 }
 0x323   :  { %v620_v25 = vadd.f32 %v619_v24, %v605_v22 }
 0x325   :  { %v624_v26 = vrot.slane %v620_v25, %v357_v44 }
 0x327   :  { %v625_v27 = vsub.f32 %v601_v9, %v624_v26 }
 0x329   :  { %626 = vst [vmem:[#allocation10] sm:$0x3] %v625_v27 }
 0x32a   :  { %851 = shalt.err (!%p848_p10)
}
 0x32b   :  { %636 = dma.vmem_to_hbm [thread:$0]  %s634_s1, 32, %s1138_s6, [#allocation8]  }
 0x32c   :  { %866 = dma.done.wait [#allocation8], 32  }
 0x32d   :  { %867 = vsyncadd [#allocation8], 4294967264 }
 0x32e   :  { %640 = vsyncpa [#allocation8], 1 }
 0x32f   :  { %641 = vsyncpa [#allocation9], 1 }

</bundles_post_ra>
